<compile_context>
chip_gen: v6e
topology: v6e:2x2x1
jax: 0.10.0
libtpu: 0.0.40
codegen_flags: <defaults>
</compile_context>

<pallas_src>
import jax
import jax.numpy as jnp
from jax.experimental import pallas as pl
from jax.experimental.pallas import tpu as pltpu

# per-joint vertex counts, exactly as in the PyTorch module
VERTEXNUM = [45, 61, 43, 45, 92, 34, 41, 62, 44, 44,
             58, 42, 40, 60, 41, 35, 64, 28, 50, 62]

FEAT = 140     # per-joint features
GLO = 60       # 20 joints * 3 coords
ZDIM = 100     # GlobalNet output width
HID = 256      # projection hidden width
K_PAD = 256    # padded K for the fused [x | z] @ W1 contraction (240 -> 256)
N_PAD = 128    # padded per-axis output lane dim (100 -> 128)


def _round_up(x, m):
    return ((x + m - 1) // m) * m


def hp2m_kernel(xin_ref, w1_ref, b1_ref, w2_ref, b2_ref, w3_ref, b3_ref,
                out_ref):
    """One grid step = one row tile across all three projection axes.

    xin_ref : (TM, 256)      bf16  [x feats(140) | z(100) | zero pad(16)]
    w1_ref  : (256, 768)     bf16  [w1_x | w1_y | w1_z] along N
    b1_ref  : (1, 768)       f32
    w2_ref  : (3, 256, 256)  bf16
    b2_ref  : (3, 1, 256)    f32
    w3_ref  : (3, 256, 128)  bf16  (output lanes zero-padded 100 -> 128)
    b3_ref  : (3, 1, 128)    f32
    out_ref : (TM, 384)      f32   [out_x(128) | out_y(128) | out_z(128)]
    """
    f32 = jnp.float32
    bf16 = jnp.bfloat16

    xin = xin_ref[...]                                            # (TM, 256)
    # fused first layer for all three axes: one big MXU matmul
    h1 = jnp.dot(xin, w1_ref[...], preferred_element_type=f32) + b1_ref[...]

    for a in range(3):                         # static unroll over x / y / z
        h1a = h1[:, a * HID:(a + 1) * HID].astype(bf16)           # (TM, 256)
        h2 = jnp.dot(h1a, w2_ref[a],
                     preferred_element_type=f32) + b2_ref[a]      # (TM, 256)
        out = jnp.dot(h2.astype(bf16), w3_ref[a],
                      preferred_element_type=f32) + b3_ref[a]     # (TM, 128)
        out_ref[:, a * N_PAD:(a + 1) * N_PAD] = out


def pack_kernel_params(params):
    """Pad / cast the logical f32 params into the kernel layout (bf16, padded)."""
    f32, bf16 = jnp.float32, jnp.bfloat16
    # w1: (3, 240, 256) -> zero-pad K 240->256, then concat axes along N.
    w1 = jnp.concatenate(
        [params["w1"], jnp.zeros((3, K_PAD - (FEAT + ZDIM), HID), f32)], axis=1)
    w1_cat = jnp.concatenate([w1[0], w1[1], w1[2]], axis=1)        # (256, 768)
    b1_cat = jnp.concatenate(
        [params["b1"][a] for a in range(3)]).reshape(1, 3 * HID)   # (1, 768)
    # w3: (3, 256, 100) -> zero-pad output lanes 100 -> 128.
    w3 = jnp.concatenate(
        [params["w3"], jnp.zeros((3, HID, N_PAD - ZDIM), f32)], axis=2)
    b3 = jnp.concatenate(
        [params["b3"], jnp.zeros((3, N_PAD - ZDIM), f32)], axis=1)
    return dict(
        w1=w1_cat.astype(bf16),                                    # (256, 768)
        b1=b1_cat.astype(f32),                                     # (1, 768)
        w2=params["w2"].astype(bf16),                              # (3, 256, 256)
        b2=params["b2"].reshape(3, 1, HID).astype(f32),            # (3, 1, 256)
        w3=w3.astype(bf16),                                        # (3, 256, 128)
        b3=b3.reshape(3, 1, N_PAD).astype(f32),                    # (3, 1, 128)
    )


def hp2m_forward(x, gloinfo, params, *, tm=None):
    B, num, feat = x.shape
    assert feat == FEAT and gloinfo.shape == (B, GLO)
    BN = B * num
    f32, bf16 = jnp.float32, jnp.bfloat16

    # --- GlobalNet hoisted out of the kernel (exact f32, tiny) ---------------
    z = jnp.maximum(jnp.dot(gloinfo, params["wg1"]) + params["bg1"], 0.0)
    z = jnp.maximum(jnp.dot(z, params["wg2"]) + params["bg2"], 0.0)   # (B, 100)

    # --- fused, K-padded kernel input: [x feats | z | zero pad] -> (BN, 256) -
    xf = x.reshape(BN, FEAT)                        # row r = b*num + i  == x[b, i]
    z_rep = jnp.repeat(z, num, axis=0)              # (BN, 100), matches xf rows
    xin = jnp.concatenate(
        [xf, z_rep, jnp.zeros((BN, K_PAD - FEAT - ZDIM), f32)], axis=1)

    # --- row tiling: TM multiple of 8 sublanes / MXU M dim -------------------
    if tm is None:
        tm = 256 if BN >= 256 else _round_up(BN, 8)
    bn_pad = _round_up(BN, tm)
    if bn_pad != BN:
        xin = jnp.pad(xin, ((0, bn_pad - BN), (0, 0)))
    xin = xin.astype(bf16)

    kp = pack_kernel_params(params)

    n_m = bn_pad // tm
    flops = 2 * bn_pad * (K_PAD * 3 * HID + 3 * (HID * HID + HID * N_PAD))
    weight_bytes = sum(int(v.size) * v.dtype.itemsize for v in kp.values())
    bytes_accessed = (bn_pad * K_PAD * 2          # xin read ONCE
                      + weight_bytes              # resident weights
                      + bn_pad * 3 * N_PAD * 4)   # f32 output

    resident = lambda shape: pl.BlockSpec(shape, lambda m: (0,) * len(shape))

    out_all = pl.pallas_call(
        hp2m_kernel,
        out_shape=jax.ShapeDtypeStruct((bn_pad, 3 * N_PAD), f32),
        grid=(n_m,),
        in_specs=[
            pl.BlockSpec((tm, K_PAD), lambda m: (m, 0)),  # xin rows stream
            resident((K_PAD, 3 * HID)),   # w1_cat (256, 768)  bf16, VMEM-resident
            resident((1, 3 * HID)),       # b1_cat (1, 768)    f32
            resident((3, HID, HID)),      # w2     (3,256,256) bf16
            resident((3, 1, HID)),        # b2     (3,1,256)   f32
            resident((3, HID, N_PAD)),    # w3     (3,256,128) bf16
            resident((3, 1, N_PAD)),      # b3     (3,1,128)   f32
        ],
        out_specs=pl.BlockSpec((tm, 3 * N_PAD), lambda m: (m, 0)),
        compiler_params=pltpu.CompilerParams(
            dimension_semantics=("parallel",),
            vmem_limit_bytes=32 * 1024 * 1024),
        cost_estimate=pl.CostEstimate(
            flops=flops, transcendentals=0, bytes_accessed=bytes_accessed),
    )(xin, kp["w1"], kp["b1"], kp["w2"], kp["b2"], kp["w3"], kp["b3"])

    # (bn_pad, 384) -> drop row / lane pads -> (B, num, 3, 100) -> (B,num,100,3)
    proj = out_all[:BN].reshape(B, num, 3, N_PAD)[..., :ZDIM]
    proj = jnp.transpose(proj, (0, 1, 3, 2))               # (B, num, 100, 3)
    # per-joint vertex slicing + concat (glue), matching
    # torch.stack([px,py,pz],2)[:, :vertexnum[i]] then cat + squeeze (B > 1).
    pieces = [proj[:, i, :VERTEXNUM[i], :] for i in range(num)]
    return jnp.concatenate(pieces, axis=1)     # (B, sum(VERTEXNUM[:num]), 3)


def init_params(key):
    """Deterministic synthetic init (PyTorch-style uniform(-1/sqrt(fan_in), ...))."""
    keys = jax.random.split(key, 11)

    def lin(k, fan_in, fan_out):
        kw, kb = jax.random.split(k)
        s = 1.0 / jnp.sqrt(jnp.float32(fan_in))
        w = jax.random.uniform(kw, (fan_in, fan_out), jnp.float32, -s, s)
        b = jax.random.uniform(kb, (fan_out,), jnp.float32, -s, s)
        return w, b

    wg1, bg1 = lin(keys[0], GLO, HID)
    wg2, bg2 = lin(keys[1], HID, ZDIM)

    w1s, b1s, w2s, b2s, w3s, b3s = [], [], [], [], [], []
    for a in range(3):  # projection_x, projection_y, projection_z
        w1, b1 = lin(keys[2 + 3 * a + 0], FEAT + ZDIM, HID)
        w2, b2 = lin(keys[2 + 3 * a + 1], HID, HID)
        w3, b3 = lin(keys[2 + 3 * a + 2], HID, ZDIM)
        w1s.append(w1); b1s.append(b1)
        w2s.append(w2); b2s.append(b2)
        w3s.append(w3); b3s.append(b3)

    return dict(
        wg1=wg1, bg1=bg1, wg2=wg2, bg2=bg2,
        w1=jnp.stack(w1s), b1=jnp.stack(b1s),     # (3, 240, 256), (3, 256)
        w2=jnp.stack(w2s), b2=jnp.stack(b2s),     # (3, 256, 256), (3, 256)
        w3=jnp.stack(w3s), b3=jnp.stack(b3s),     # (3, 256, 100), (3, 100)
    )


def hp2m_reference(x, gloinfo, params):
    """Plain-JAX f32 reference mirroring the PyTorch forward exactly."""
    hp = lambda a, b: jnp.dot(a, b, precision=jax.lax.Precision.HIGHEST)
    z = jnp.maximum(hp(gloinfo, params["wg1"]) + params["bg1"], 0.0)
    z = jnp.maximum(hp(z, params["wg2"]) + params["bg2"], 0.0)        # (B, 100)
    B, num, _ = x.shape
    y = jnp.swapaxes(x, 1, 2)                                         # (B,140,num)
    outs = []
    for i in range(num):
        feed = jnp.concatenate([y[:, :, i], z], axis=1)               # (B, 240)
        per_axis = []
        for a in range(3):
            h1 = hp(feed, params["w1"][a]) + params["b1"][a]
            h2 = hp(h1, params["w2"][a]) + params["b2"][a]
            per_axis.append(hp(h2, params["w3"][a]) + params["b3"][a])
        proj = jnp.stack(per_axis, axis=2)                            # (B,100,3)
        outs.append(proj[:, :VERTEXNUM[i], :])
    return jnp.concatenate(outs, axis=1)


if __name__ == "__main__":
    key = jax.random.PRNGKey(0)
    kx, kg, kp = jax.random.split(key, 3)

    B, num = 2, 4                      # small: 4 of the 20 joints
    x = jax.random.normal(kx, (B, num, FEAT), jnp.float32)
    gloinfo = jax.random.normal(kg, (B, GLO), jnp.float32)  # 20 joints * 3
    params = init_params(kp)

    fwd = jax.jit(hp2m_forward)
    out = jax.block_until_ready(fwd(x, gloinfo, params))

    total = sum(VERTEXNUM[:num])
    assert out.shape == (B, total, 3), out.shape

    ref = hp2m_reference(x, gloinfo, params)
    err = float(jnp.max(jnp.abs(out - ref)))
    # bf16 matmul operands with f32 accumulation: tolerance loosened vs pure-f32.
    assert err < 3e-2, err

    print("KERNEL_OK")
</pallas_src>

<mosaic_0001>
module attributes {stable_mosaic.version = 11 : i64} {
  func.func @hp2m_kernel(%arg0: i32, %arg1: memref<8x256xbf16, #tpu.memory_space<vmem>>, %arg2: memref<256x768xbf16, #tpu.memory_space<vmem>>, %arg3: memref<1x768xf32, #tpu.memory_space<vmem>>, %arg4: memref<3x256x256xbf16, #tpu.memory_space<vmem>>, %arg5: memref<3x1x256xf32, #tpu.memory_space<vmem>>, %arg6: memref<3x256x128xbf16, #tpu.memory_space<vmem>>, %arg7: memref<3x1x128xf32, #tpu.memory_space<vmem>>, %arg8: memref<8x384xf32, #tpu.memory_space<vmem>>) attributes {dimension_semantics = [#tpu.dimension_semantics<parallel>], iteration_bounds = array<i64: 1>, scalar_prefetch = 0 : i64, scratch_operands = 0 : i64, tpu.core_type = #tpu.core_type<tc>, window_params = [{transform_indices = @transform_0, window_bounds = array<i64: 8, 256>}, {pipeline_mode = #tpu.pipeline_mode<synchronous>, transform_indices = @transform_1, window_bounds = array<i64: 256, 768>}, {pipeline_mode = #tpu.pipeline_mode<synchronous>, transform_indices = @transform_2, window_bounds = array<i64: 1, 768>}, {pipeline_mode = #tpu.pipeline_mode<synchronous>, transform_indices = @transform_3, window_bounds = array<i64: 3, 256, 256>}, {pipeline_mode = #tpu.pipeline_mode<synchronous>, transform_indices = @transform_4, window_bounds = array<i64: 3, 1, 256>}, {pipeline_mode = #tpu.pipeline_mode<synchronous>, transform_indices = @transform_5, window_bounds = array<i64: 3, 256, 128>}, {pipeline_mode = #tpu.pipeline_mode<synchronous>, transform_indices = @transform_6, window_bounds = array<i64: 3, 1, 128>}, {transform_indices = @transform_7, window_bounds = array<i64: 8, 384>}]} {
    %c0 = arith.constant 0 : index
    %c0_0 = arith.constant 0 : index
    %0 = vector.load %arg1[%c0, %c0_0] : memref<8x256xbf16, #tpu.memory_space<vmem>>, vector<8x256xbf16>
    %c0_1 = arith.constant 0 : index
    %c0_2 = arith.constant 0 : index
    %1 = vector.load %arg2[%c0_1, %c0_2] : memref<256x768xbf16, #tpu.memory_space<vmem>>, vector<256x768xbf16>
    %cst = arith.constant dense<0.000000e+00> : vector<8x768xf32>
    %2 = tpu.matmul %0, %1, %cst {dimension_numbers = #tpu.dot_dimension_numbers<[1], [0], [0], [1], [0, 0, 1, 1], [], []>} : vector<8x256xbf16>, vector<256x768xbf16>, vector<8x768xf32> -> vector<8x768xf32>
    %c0_3 = arith.constant 0 : index
    %c0_4 = arith.constant 0 : index
    %3 = vector.load %arg3[%c0_3, %c0_4] : memref<1x768xf32, #tpu.memory_space<vmem>>, vector<1x768xf32>
    %4 = vector.broadcast %3 : vector<1x768xf32> to vector<8x768xf32>
    %5 = arith.addf %2, %4 : vector<8x768xf32>
    %6 = vector.extract_strided_slice %5 {offsets = [0, 0], sizes = [8, 256], strides = [1, 1]} : vector<8x768xf32> to vector<8x256xf32>
    %7 = arith.truncf %6 : vector<8x256xf32> to vector<8x256xbf16>
    %c0_5 = arith.constant 0 : index
    %c0_6 = arith.constant 0 : index
    %c0_7 = arith.constant 0 : index
    %8 = vector.load %arg4[%c0_5, %c0_6, %c0_7] : memref<3x256x256xbf16, #tpu.memory_space<vmem>>, vector<1x256x256xbf16>
    %9 = vector.shape_cast %8 : vector<1x256x256xbf16> to vector<256x256xbf16>
    %cst_8 = arith.constant dense<0.000000e+00> : vector<8x256xf32>
    %10 = tpu.matmul %7, %9, %cst_8 {dimension_numbers = #tpu.dot_dimension_numbers<[1], [0], [0], [1], [0, 0, 1, 1], [], []>} : vector<8x256xbf16>, vector<256x256xbf16>, vector<8x256xf32> -> vector<8x256xf32>
    %c0_9 = arith.constant 0 : index
    %c0_10 = arith.constant 0 : index
    %c0_11 = arith.constant 0 : index
    %11 = vector.load %arg5[%c0_9, %c0_10, %c0_11] : memref<3x1x256xf32, #tpu.memory_space<vmem>>, vector<1x1x256xf32>
    %12 = vector.shape_cast %11 : vector<1x1x256xf32> to vector<1x256xf32>
    %13 = vector.broadcast %12 : vector<1x256xf32> to vector<8x256xf32>
    %14 = arith.addf %10, %13 : vector<8x256xf32>
    %15 = arith.truncf %14 : vector<8x256xf32> to vector<8x256xbf16>
    %c0_12 = arith.constant 0 : index
    %c0_13 = arith.constant 0 : index
    %c0_14 = arith.constant 0 : index
    %16 = vector.load %arg6[%c0_12, %c0_13, %c0_14] : memref<3x256x128xbf16, #tpu.memory_space<vmem>>, vector<1x256x128xbf16>
    %17 = vector.shape_cast %16 : vector<1x256x128xbf16> to vector<256x128xbf16>
    %cst_15 = arith.constant dense<0.000000e+00> : vector<8x128xf32>
    %18 = tpu.matmul %15, %17, %cst_15 {dimension_numbers = #tpu.dot_dimension_numbers<[1], [0], [0], [1], [0, 0, 1, 1], [], []>} : vector<8x256xbf16>, vector<256x128xbf16>, vector<8x128xf32> -> vector<8x128xf32>
    %c0_16 = arith.constant 0 : index
    %c0_17 = arith.constant 0 : index
    %c0_18 = arith.constant 0 : index
    %19 = vector.load %arg7[%c0_16, %c0_17, %c0_18] : memref<3x1x128xf32, #tpu.memory_space<vmem>>, vector<1x1x128xf32>
    %20 = vector.shape_cast %19 : vector<1x1x128xf32> to vector<1x128xf32>
    %21 = vector.broadcast %20 : vector<1x128xf32> to vector<8x128xf32>
    %22 = arith.addf %18, %21 : vector<8x128xf32>
    %c0_19 = arith.constant 0 : index
    %c0_20 = arith.constant 0 : index
    %23 = vector.load %arg8[%c0_19, %c0_20] : memref<8x384xf32, #tpu.memory_space<vmem>>, vector<8x128xf32>
    tpu.vector_store %arg8[%c0_19, %c0_20], %22 {strides = array<i32>} : memref<8x384xf32, #tpu.memory_space<vmem>>, vector<8x128xf32>,
    %24 = vector.extract_strided_slice %5 {offsets = [0, 256], sizes = [8, 256], strides = [1, 1]} : vector<8x768xf32> to vector<8x256xf32>
    %25 = arith.truncf %24 : vector<8x256xf32> to vector<8x256xbf16>
    %c1 = arith.constant 1 : index
    %c0_21 = arith.constant 0 : index
    %c0_22 = arith.constant 0 : index
    %26 = vector.load %arg4[%c1, %c0_21, %c0_22] : memref<3x256x256xbf16, #tpu.memory_space<vmem>>, vector<1x256x256xbf16>
    %27 = vector.shape_cast %26 : vector<1x256x256xbf16> to vector<256x256xbf16>
    %cst_23 = arith.constant dense<0.000000e+00> : vector<8x256xf32>
    %28 = tpu.matmul %25, %27, %cst_23 {dimension_numbers = #tpu.dot_dimension_numbers<[1], [0], [0], [1], [0, 0, 1, 1], [], []>} : vector<8x256xbf16>, vector<256x256xbf16>, vector<8x256xf32> -> vector<8x256xf32>
    %c1_24 = arith.constant 1 : index
    %c0_25 = arith.constant 0 : index
    %c0_26 = arith.constant 0 : index
    %29 = vector.load %arg5[%c1_24, %c0_25, %c0_26] : memref<3x1x256xf32, #tpu.memory_space<vmem>>, vector<1x1x256xf32>
    %30 = vector.shape_cast %29 : vector<1x1x256xf32> to vector<1x256xf32>
    %31 = vector.broadcast %30 : vector<1x256xf32> to vector<8x256xf32>
    %32 = arith.addf %28, %31 : vector<8x256xf32>
    %33 = arith.truncf %32 : vector<8x256xf32> to vector<8x256xbf16>
    %c1_27 = arith.constant 1 : index
    %c0_28 = arith.constant 0 : index
    %c0_29 = arith.constant 0 : index
    %34 = vector.load %arg6[%c1_27, %c0_28, %c0_29] : memref<3x256x128xbf16, #tpu.memory_space<vmem>>, vector<1x256x128xbf16>
    %35 = vector.shape_cast %34 : vector<1x256x128xbf16> to vector<256x128xbf16>
    %cst_30 = arith.constant dense<0.000000e+00> : vector<8x128xf32>
    %36 = tpu.matmul %33, %35, %cst_30 {dimension_numbers = #tpu.dot_dimension_numbers<[1], [0], [0], [1], [0, 0, 1, 1], [], []>} : vector<8x256xbf16>, vector<256x128xbf16>, vector<8x128xf32> -> vector<8x128xf32>
    %c1_31 = arith.constant 1 : index
    %c0_32 = arith.constant 0 : index
    %c0_33 = arith.constant 0 : index
    %37 = vector.load %arg7[%c1_31, %c0_32, %c0_33] : memref<3x1x128xf32, #tpu.memory_space<vmem>>, vector<1x1x128xf32>
    %38 = vector.shape_cast %37 : vector<1x1x128xf32> to vector<1x128xf32>
    %39 = vector.broadcast %38 : vector<1x128xf32> to vector<8x128xf32>
    %40 = arith.addf %36, %39 : vector<8x128xf32>
    %c0_34 = arith.constant 0 : index
    %c128 = arith.constant 128 : index
    %41 = vector.load %arg8[%c0_34, %c128] : memref<8x384xf32, #tpu.memory_space<vmem>>, vector<8x128xf32>
    tpu.vector_store %arg8[%c0_34, %c128], %40 {strides = array<i32>} : memref<8x384xf32, #tpu.memory_space<vmem>>, vector<8x128xf32>,
    %42 = vector.extract_strided_slice %5 {offsets = [0, 512], sizes = [8, 256], strides = [1, 1]} : vector<8x768xf32> to vector<8x256xf32>
    %43 = arith.truncf %42 : vector<8x256xf32> to vector<8x256xbf16>
    %c2 = arith.constant 2 : index
    %c0_35 = arith.constant 0 : index
    %c0_36 = arith.constant 0 : index
    %44 = vector.load %arg4[%c2, %c0_35, %c0_36] : memref<3x256x256xbf16, #tpu.memory_space<vmem>>, vector<1x256x256xbf16>
    %45 = vector.shape_cast %44 : vector<1x256x256xbf16> to vector<256x256xbf16>
    %cst_37 = arith.constant dense<0.000000e+00> : vector<8x256xf32>
    %46 = tpu.matmul %43, %45, %cst_37 {dimension_numbers = #tpu.dot_dimension_numbers<[1], [0], [0], [1], [0, 0, 1, 1], [], []>} : vector<8x256xbf16>, vector<256x256xbf16>, vector<8x256xf32> -> vector<8x256xf32>
    %c2_38 = arith.constant 2 : index
    %c0_39 = arith.constant 0 : index
    %c0_40 = arith.constant 0 : index
    %47 = vector.load %arg5[%c2_38, %c0_39, %c0_40] : memref<3x1x256xf32, #tpu.memory_space<vmem>>, vector<1x1x256xf32>
    %48 = vector.shape_cast %47 : vector<1x1x256xf32> to vector<1x256xf32>
    %49 = vector.broadcast %48 : vector<1x256xf32> to vector<8x256xf32>
    %50 = arith.addf %46, %49 : vector<8x256xf32>
    %51 = arith.truncf %50 : vector<8x256xf32> to vector<8x256xbf16>
    %c2_41 = arith.constant 2 : index
    %c0_42 = arith.constant 0 : index
    %c0_43 = arith.constant 0 : index
    %52 = vector.load %arg6[%c2_41, %c0_42, %c0_43] : memref<3x256x128xbf16, #tpu.memory_space<vmem>>, vector<1x256x128xbf16>
    %53 = vector.shape_cast %52 : vector<1x256x128xbf16> to vector<256x128xbf16>
    %cst_44 = arith.constant dense<0.000000e+00> : vector<8x128xf32>
    %54 = tpu.matmul %51, %53, %cst_44 {dimension_numbers = #tpu.dot_dimension_numbers<[1], [0], [0], [1], [0, 0, 1, 1], [], []>} : vector<8x256xbf16>, vector<256x128xbf16>, vector<8x128xf32> -> vector<8x128xf32>
    %c2_45 = arith.constant 2 : index
    %c0_46 = arith.constant 0 : index
    %c0_47 = arith.constant 0 : index
    %55 = vector.load %arg7[%c2_45, %c0_46, %c0_47] : memref<3x1x128xf32, #tpu.memory_space<vmem>>, vector<1x1x128xf32>
    %56 = vector.shape_cast %55 : vector<1x1x128xf32> to vector<1x128xf32>
    %57 = vector.broadcast %56 : vector<1x128xf32> to vector<8x128xf32>
    %58 = arith.addf %54, %57 : vector<8x128xf32>
    %c0_48 = arith.constant 0 : index
    %c256 = arith.constant 256 : index
    %59 = vector.load %arg8[%c0_48, %c256] : memref<8x384xf32, #tpu.memory_space<vmem>>, vector<8x128xf32>
    tpu.vector_store %arg8[%c0_48, %c256], %58 {strides = array<i32>} : memref<8x384xf32, #tpu.memory_space<vmem>>, vector<8x128xf32>,
    return
  }
  func.func @transform_0(%arg0: i32) -> (i32, i32) {
    %c0_i32 = arith.constant 0 : i32
    %c0_i32_0 = arith.constant 0 : i32
    return %arg0, %c0_i32 : i32, i32
  }
  func.func @transform_1(%arg0: i32) -> (i32, i32) {
    %c0_i32 = arith.constant 0 : i32
    %c0_i32_0 = arith.constant 0 : i32
    %c0_i32_1 = arith.constant 0 : i32
    return %c0_i32, %c0_i32_0 : i32, i32
  }
  func.func @transform_2(%arg0: i32) -> (i32, i32) {
    %c0_i32 = arith.constant 0 : i32
    %c0_i32_0 = arith.constant 0 : i32
    %c0_i32_1 = arith.constant 0 : i32
    return %c0_i32, %c0_i32_0 : i32, i32
  }
  func.func @transform_3(%arg0: i32) -> (i32, i32, i32) {
    %c0_i32 = arith.constant 0 : i32
    %c0_i32_0 = arith.constant 0 : i32
    %c0_i32_1 = arith.constant 0 : i32
    %c0_i32_2 = arith.constant 0 : i32
    return %c0_i32, %c0_i32_0, %c0_i32_1 : i32, i32, i32
  }
  func.func @transform_4(%arg0: i32) -> (i32, i32, i32) {
    %c0_i32 = arith.constant 0 : i32
    %c0_i32_0 = arith.constant 0 : i32
    %c0_i32_1 = arith.constant 0 : i32
    %c0_i32_2 = arith.constant 0 : i32
    return %c0_i32, %c0_i32_0, %c0_i32_1 : i32, i32, i32
  }
  func.func @transform_5(%arg0: i32) -> (i32, i32, i32) {
    %c0_i32 = arith.constant 0 : i32
    %c0_i32_0 = arith.constant 0 : i32
    %c0_i32_1 = arith.constant 0 : i32
    %c0_i32_2 = arith.constant 0 : i32
    return %c0_i32, %c0_i32_0, %c0_i32_1 : i32, i32, i32
  }
  func.func @transform_6(%arg0: i32) -> (i32, i32, i32) {
    %c0_i32 = arith.constant 0 : i32
    %c0_i32_0 = arith.constant 0 : i32
    %c0_i32_1 = arith.constant 0 : i32
    %c0_i32_2 = arith.constant 0 : i32
    return %c0_i32, %c0_i32_0, %c0_i32_1 : i32, i32, i32
  }
  func.func @transform_7(%arg0: i32) -> (i32, i32) {
    %c0_i32 = arith.constant 0 : i32
    %c0_i32_0 = arith.constant 0 : i32
    return %arg0, %c0_i32 : i32, i32
  }
}

</mosaic_0001>

<bundles_post_ra>
// kernel: hp2m_forward.1
= control target key start
LH: loop header
LB: loop body
LE: loop exit
PB: predicated region body
PF: predicated region fallthrough
CT: control target
= control target key end

     0   :  { %s3674_s1 = inlined_call_operand.vmem [shape: bf16[256,768], index: 1, kind: input, shape index: {}]   ;;  %s3675_s0 = inlined_call_operand.vmem [shape: bf16[8,256], index: 0, kind: input, shape index: {}]   ;;  %s3676_s3 = inlined_call_operand.vmem [shape: bf16[3,256,256], index: 3, kind: input, shape index: {}]   ;;  %s3677_s5 = inlined_call_operand.vmem [shape: bf16[3,256,128], index: 5, kind: input, shape index: {}]   ;;  %s3678_s2 = inlined_call_operand.vmem [shape: f32[1,768], index: 2, kind: input, shape index: {}]   ;;  %s3679_s4 = inlined_call_operand.vmem [shape: f32[3,1,256], index: 4, kind: input, shape index: {}]   ;;  %s3680_s6 = inlined_call_operand.vmem [shape: f32[3,1,128], index: 6, kind: input, shape index: {}]   ;;  %s3681_s7 = inlined_call_operand.vmem [shape: f32[8,384], index: 7, kind: output, shape index: {}]  }
   0x1   :  { %v2496_v0 = vld [vmem:[%s3674_s1 + $0x154] ss:$24 sps:$4 sm:$0xff]   ;;  %v2498_v1 = vld [vmem:[%s3674_s1 + $0x150] ss:$24 sps:$4 sm:$0xff]   ;;  %v2499_v2 = vld [vmem:[%s3674_s1 + $0x124] ss:$24 sps:$4 sm:$0xff]  }
   0x2   :  { %643 = vmatprep.subr.bf16.mxu0 %v2496_v0  ;;  %v2501_v3 = vld [vmem:[%s3674_s1 + $0x120] ss:$24 sps:$4 sm:$0xff]   ;;  %v2502_v4 = vld [vmem:[%s3674_s1 + $0xf4] ss:$24 sps:$4 sm:$0xff]   ;;  %v2504_v5 = vld [vmem:[%s3674_s1 + $0xf0] ss:$24 sps:$4 sm:$0xff]  }
   0x3   :  { %644 = vmatpush1.bf16.msra.mxu0 %v2498_v1  ;;  %v2505_v6 = vld [vmem:[%s3674_s1 + $0xc4] ss:$24 sps:$4 sm:$0xff]   ;;  %v2507_v7 = vld [vmem:[%s3674_s1 + $0xc0] ss:$24 sps:$4 sm:$0xff]   ;;  %v2508_v8 = vld [vmem:[%s3674_s1 + $0x94] ss:$24 sps:$4 sm:$0xff]  }
   0x4   :  { %645 = vmatprep.subr.bf16.mxu0 %v2499_v2  ;;  %v2510_v9 = vld [vmem:[%s3674_s1 + $0x90] ss:$24 sps:$4 sm:$0xff]   ;;  %v2511_v10 = vld [vmem:[%s3674_s1 + $0x64] ss:$24 sps:$4 sm:$0xff]   ;;  %v2513_v11 = vld [vmem:[%s3674_s1 + $0x60] ss:$24 sps:$4 sm:$0xff]  }
   0x5   :  { %v2514_v12 = vld [vmem:[%s3674_s1 + $0x34] ss:$24 sps:$4 sm:$0xff]   ;;  %v2543_v14 = vld [vmem:[%s3674_s1 + $0x158] ss:$24 sps:$4 sm:$0xff]   ;;  %v2517_v16 = vld [vmem:[%s3674_s1 + $0x4] ss:$24 sps:$4 sm:$0xff]  }
   0x6   :  { %v2541_v13 = vld [vmem:[%s3674_s1 + $0x15c] ss:$24 sps:$4 sm:$0xff]   ;;  %v2516_v15 = vld [vmem:[%s3674_s1 + $0x30] ss:$24 sps:$4 sm:$0xff]   ;;  %v2547_v17 = vld [vmem:[%s3674_s1 + $0x12c] ss:$24 sps:$4 sm:$0xff]  }
   0x7   :  { %646 = vmatpush1.bf16.msra.mxu0 %v2501_v3  ;;  %684 = vmatprep.subr.bf16.mxu1 %v2541_v13  ;;  %v2549_v18 = vld [vmem:[%s3674_s1 + $0x128] ss:$24 sps:$4 sm:$0xff]   ;;  %v2552_v21 = vld [vmem:[%s3674_s1 + $0xfc] ss:$24 sps:$4 sm:$0xff]   ;;  %v2554_v24 = vld [vmem:[%s3674_s1 + $0xf8] ss:$24 sps:$4 sm:$0xff]  }
   0x8   :  { %647 = vmatprep.subr.bf16.mxu0 %v2502_v4  ;;  %685 = vmatpush1.bf16.msra.mxu1 %v2543_v14  ;;  %v2934_v19 = vld [vmem:[%s3675_s0] sm:$0xff]  ;;  %v2520_v23 = vld [vmem:[%s3674_s1 + $0x2d4] ss:$24 sps:$4 sm:$0xff]   ;;  %v2522_v26 = vld [vmem:[%s3674_s1 + $0x2d0] ss:$24 sps:$4 sm:$0xff]  }
   0x9   :  { %686 = vmatprep.subr.bf16.mxu1 %v2547_v17  ;;  %v2938_v20 = vcombine.high %v2934_v19, %v2934_v19  ;;  %v2519_v22 = vld [vmem:[%s3674_s1] ss:$24 sps:$4 sm:$0xff]   ;;  %v2555_v25 = vld [vmem:[%s3674_s1 + $0xcc] ss:$24 sps:$4 sm:$0xff]   ;;  %v2558_v29 = vld [vmem:[%s3674_s1 + $0x9c] ss:$24 sps:$4 sm:$0xff]   ;;  %v3052_v57 = vcombine.low %v2934_v19, %v2934_v19 }
   0xa   :  { %v2523_v27 = vld [vmem:[%s3674_s1 + $0x2a4] ss:$24 sps:$4 sm:$0xff]   ;;  %v2557_v28 = vld [vmem:[%s3674_s1 + $0xc8] ss:$24 sps:$4 sm:$0xff]   ;;  %v2526_v31 = vld [vmem:[%s3674_s1 + $0x274] ss:$24 sps:$4 sm:$0xff]  }
   0xb   :  { %648 = vmatpush1.bf16.msra.mxu0 %v2504_v5  ;;  %675 = vmatprep.mubr.bf16.mxu0 %v2938_v20  ;;  %v2525_v30 = vld [vmem:[%s3674_s1 + $0x2a0] ss:$24 sps:$4 sm:$0xff]   ;;  %v2561_v33 = vld [vmem:[%s3674_s1 + $0x6c] ss:$24 sps:$4 sm:$0xff]   ;;  %v2528_v34 = vld [vmem:[%s3674_s1 + $0x270] ss:$24 sps:$4 sm:$0xff]  }
   0xc   :  { %649 = vmatprep.subr.bf16.mxu0 %v2505_v6  ;;  %687 = vmatpush1.bf16.msra.mxu1 %v2549_v18  ;;  %v2560_v32 = vld [vmem:[%s3674_s1 + $0x98] ss:$24 sps:$4 sm:$0xff]   ;;  %v2529_v35 = vld [vmem:[%s3674_s1 + $0x244] ss:$24 sps:$4 sm:$0xff]   ;;  %v2563_v36 = vld [vmem:[%s3674_s1 + $0x68] ss:$24 sps:$4 sm:$0xff]  }
   0xd   :  { %688 = vmatprep.subr.bf16.mxu1 %v2552_v21  ;;  %716 = vmatprep.mubr.bf16.mxu1 %v2938_v20  ;;  %v2564_v37 = vld [vmem:[%s3674_s1 + $0x3c] ss:$24 sps:$4 sm:$0xff]   ;;  %v2531_v38 = vld [vmem:[%s3674_s1 + $0x240] ss:$24 sps:$4 sm:$0xff]   ;;  %v2567_v41 = vld [vmem:[%s3674_s1 + $0xc] ss:$24 sps:$4 sm:$0xff]  }
   0xe   :  { %v2532_v39 = vld [vmem:[%s3674_s1 + $0x214] ss:$24 sps:$4 sm:$0xff]   ;;  %v2566_v40 = vld [vmem:[%s3674_s1 + $0x38] ss:$24 sps:$4 sm:$0xff]   ;;  %v2535_v43 = vld [vmem:[%s3674_s1 + $0x1e4] ss:$24 sps:$4 sm:$0xff]  }
   0xf   :  { %650 = vmatpush1.bf16.msra.mxu0 %v2507_v7  ;;  %v2534_v42 = vld [vmem:[%s3674_s1 + $0x210] ss:$24 sps:$4 sm:$0xff]   ;;  %v2570_v45 = vld [vmem:[%s3674_s1 + $0x2dc] ss:$24 sps:$4 sm:$0xff]   ;;  %v2537_v46 = vld [vmem:[%s3674_s1 + $0x1e0] ss:$24 sps:$4 sm:$0xff]  }
  0x10   :  { %651 = vmatprep.subr.bf16.mxu0 %v2508_v8  ;;  %689 = vmatpush1.bf16.msra.mxu1 %v2554_v24  ;;  %v2569_v44 = vld [vmem:[%s3674_s1 + $0x8] ss:$24 sps:$4 sm:$0xff]   ;;  %v2538_v47 = vld [vmem:[%s3674_s1 + $0x1b4] ss:$24 sps:$4 sm:$0xff]   ;;  %v2572_v48 = vld [vmem:[%s3674_s1 + $0x2d8] ss:$24 sps:$4 sm:$0xff]  }
  0x11   :  { %690 = vmatprep.subr.bf16.mxu1 %v2555_v25  ;;  %v2573_v49 = vld [vmem:[%s3674_s1 + $0x2ac] ss:$24 sps:$4 sm:$0xff]   ;;  %v2540_v50 = vld [vmem:[%s3674_s1 + $0x1b0] ss:$24 sps:$4 sm:$0xff]   ;;  %v2576_v53 = vld [vmem:[%s3674_s1 + $0x27c] ss:$24 sps:$4 sm:$0xff]  }
  0x12   :  { %v2544_v51 = vld [vmem:[%s3674_s1 + $0x184] ss:$24 sps:$4 sm:$0xff]   ;;  %v2575_v52 = vld [vmem:[%s3674_s1 + $0x2a8] ss:$24 sps:$4 sm:$0xff]   ;;  %v2578_v55 = vld [vmem:[%s3674_s1 + $0x278] ss:$24 sps:$4 sm:$0xff]  }
  0x13   :  { %652 = vmatpush1.bf16.msra.mxu0 %v2510_v9  ;;  %v2546_v54 = vld [vmem:[%s3674_s1 + $0x180] ss:$24 sps:$4 sm:$0xff]   ;;  %v2579_v56 = vld [vmem:[%s3674_s1 + $0x24c] ss:$24 sps:$4 sm:$0xff]   ;;  %v2582_v59 = vld [vmem:[%s3674_s1 + $0x21c] ss:$24 sps:$4 sm:$0xff]  }
  0x14   :  { %653 = vmatprep.subr.bf16.mxu0 %v2511_v10  ;;  %691 = vmatpush1.bf16.msra.mxu1 %v2557_v28  ;;  %v2581_v58 = vld [vmem:[%s3674_s1 + $0x248] ss:$24 sps:$4 sm:$0xff]   ;;  %v2584_v60 = vld [vmem:[%s3674_s1 + $0x218] ss:$24 sps:$4 sm:$0xff]   ;;  %v2585_v61 = vld [vmem:[%s3674_s1 + $0x1ec] ss:$24 sps:$4 sm:$0xff]  }
  0x15   :  { %692 = vmatprep.subr.bf16.mxu1 %v2558_v29  ;;  %v2587_v62 = vld [vmem:[%s3674_s1 + $0x1e8] ss:$24 sps:$4 sm:$0xff]   ;;  %v2588_v63 = vld [vmem:[%s3674_s1 + $0x1bc] ss:$24 sps:$4 sm:$0xff]   ;;  %v2590_v0 = vld [vmem:[%s3674_s1 + $0x1b8] ss:$24 sps:$4 sm:$0xff]  }
  0x16   :  { %v2591_v1 = vld [vmem:[%s3674_s1 + $0x18c] ss:$24 sps:$4 sm:$0xff]   ;;  %v2593_v2 = vld [vmem:[%s3674_s1 + $0x188] ss:$24 sps:$4 sm:$0xff]   ;;  %v2596_v3 = vld [vmem:[%s3676_s3 + $0x74] ss:$8 sps:$4 sm:$0xff]  }
  0x17   :  { %654 = vmatpush1.bf16.msra.mxu0 %v2513_v11  ;;  %v2594_v4 = vld [vmem:[%s3676_s3 + $0x70] ss:$8 sps:$4 sm:$0xff]   ;;  %v2599_v5 = vld [vmem:[%s3676_s3 + $0x64] ss:$8 sps:$4 sm:$0xff]   ;;  %v2597_v6 = vld [vmem:[%s3676_s3 + $0x60] ss:$8 sps:$4 sm:$0xff]  }
  0x18   :  { %655 = vmatprep.subr.bf16.mxu0 %v2514_v12  ;;  %693 = vmatpush1.bf16.msra.mxu1 %v2560_v32  ;;  %v2602_v7 = vld [vmem:[%s3676_s3 + $0x54] ss:$8 sps:$4 sm:$0xff]   ;;  %v2600_v8 = vld [vmem:[%s3676_s3 + $0x50] ss:$8 sps:$4 sm:$0xff]   ;;  %v2605_v9 = vld [vmem:[%s3676_s3 + $0x44] ss:$8 sps:$4 sm:$0xff]  }
  0x19   :  { %694 = vmatprep.subr.bf16.mxu1 %v2561_v33  ;;  %v2603_v10 = vld [vmem:[%s3676_s3 + $0x40] ss:$8 sps:$4 sm:$0xff]   ;;  %v2608_v11 = vld [vmem:[%s3676_s3 + $0x34] ss:$8 sps:$4 sm:$0xff]   ;;  %v2606_v12 = vld [vmem:[%s3676_s3 + $0x30] ss:$8 sps:$4 sm:$0xff]  }
  0x1a   :  { %v2611_v13 = vld [vmem:[%s3676_s3 + $0x24] ss:$8 sps:$4 sm:$0xff]   ;;  %v2609_v14 = vld [vmem:[%s3676_s3 + $0x20] ss:$8 sps:$4 sm:$0xff]   ;;  %v2620_v19 = vld [vmem:[%s3676_s3 + $0xf4] ss:$8 sps:$4 sm:$0xff]  }
  0x1b   :  { %656 = vmatpush1.bf16.msra.mxu0 %v2516_v15  ;;  %v2614_v15 = vld [vmem:[%s3676_s3 + $0x14] ss:$8 sps:$4 sm:$0xff]   ;;  %v2617_v17 = vld [vmem:[%s3676_s3 + $0x4] ss:$8 sps:$4 sm:$0xff]   ;;  %v2615_v18 = vld [vmem:[%s3676_s3] ss:$8 sps:$4 sm:$0xff]  }
  0x1c   :  { %657 = vmatprep.subr.bf16.mxu0 %v2517_v16  ;;  %695 = vmatpush1.bf16.msra.mxu1 %v2563_v36  ;;  %v2612_v16 = vld [vmem:[%s3676_s3 + $0x10] ss:$8 sps:$4 sm:$0xff]   ;;  %v2623_v21 = vld [vmem:[%s3676_s3 + $0xe4] ss:$8 sps:$4 sm:$0xff]  }
  0x1d   :  { %696 = vmatprep.subr.bf16.mxu1 %v2564_v37  ;;  %v2624_v24 = vld [vmem:[%s3676_s3 + $0xd0] ss:$8 sps:$4 sm:$0xff]   ;;  %v2629_v25 = vld [vmem:[%s3676_s3 + $0xc4] ss:$8 sps:$4 sm:$0xff]  }
  0x1e   :  { %v2630_v28 = vld [vmem:[%s3676_s3 + $0xb0] ss:$8 sps:$4 sm:$0xff]   ;;  %v2635_v29 = vld [vmem:[%s3676_s3 + $0xa4] ss:$8 sps:$4 sm:$0xff]  }
  0x1f   :  { %658 = vmatpush1.bf16.msra.mxu0 %v2519_v22  ;;  %v2621_v22 = vld [vmem:[%s3676_s3 + $0xe0] ss:$8 sps:$4 sm:$0xff]   ;;  %v2636_v32 = vld [vmem:[%s3676_s3 + $0x90] ss:$8 sps:$4 sm:$0xff]   ;;  %v2641_v33 = vld [vmem:[%s3676_s3 + $0x84] ss:$8 sps:$4 sm:$0xff]  }
  0x20   :  { %659 = vmatprep.subr.bf16.mxu0 %v2520_v23  ;;  %697 = vmatpush1.bf16.msra.mxu1 %v2566_v40  ;;  %v2626_v23 = vld [vmem:[%s3676_s3 + $0xd4] ss:$8 sps:$4 sm:$0xff]   ;;  %v2687_v36 = vld [vmem:[%s3674_s1 + $0x160] ss:$24 sps:$4 sm:$0xff]  }
  0x21   :  { %698 = vmatprep.subr.bf16.mxu1 %v2567_v41  ;;  %v2689_v37 = vld [vmem:[%s3674_s1 + $0x164] ss:$24 sps:$4 sm:$0xff]   ;;  %v2696_v41 = vld [vmem:[%s3674_s1 + $0x100] ss:$24 sps:$4 sm:$0xff]  }
  0x22   :  { %v2698_v40 = vld [vmem:[%s3674_s1 + $0x104] ss:$24 sps:$4 sm:$0xff]  }
  0x23   :  { %660 = vmatpush2.bf16.msra.mxu0 %v2522_v26  ;;  %v2627_v26 = vld [vmem:[%s3676_s3 + $0xc0] ss:$8 sps:$4 sm:$0xff]  }
  0x24   :  { %661 = vmatprep.subr.bf16.mxu0 %v2523_v27  ;;  %699 = vmatpush1.bf16.msra.mxu1 %v2569_v44  ;;  %v2632_v27 = vld [vmem:[%s3676_s3 + $0xb4] ss:$8 sps:$4 sm:$0xff]  }
  0x25   :  { %700 = vmatprep.subr.bf16.mxu1 %v2570_v45  ;;  %v2704_v44 = vld [vmem:[%s3674_s1 + $0xa4] ss:$24 sps:$4 sm:$0xff]   ;;  %v2702_v45 = vld [vmem:[%s3674_s1 + $0xa0] ss:$24 sps:$4 sm:$0xff]  }
  0x27   :  { %662 = vmatpush2.bf16.msra.mxu0 %v2525_v30  ;;  %v2633_v30 = vld [vmem:[%s3676_s3 + $0xa0] ss:$8 sps:$4 sm:$0xff]  }
  0x28   :  { %663 = vmatprep.subr.bf16.mxu0 %v2526_v31  ;;  %701 = vmatpush2.bf16.msra.mxu1 %v2572_v48  ;;  %v2638_v31 = vld [vmem:[%s3676_s3 + $0x94] ss:$8 sps:$4 sm:$0xff]  }
  0x29   :  { %702 = vmatprep.subr.bf16.mxu1 %v2573_v49  ;;  %v2710_v48 = vld [vmem:[%s3674_s1 + $0x44] ss:$24 sps:$4 sm:$0xff]   ;;  %v2708_v49 = vld [vmem:[%s3674_s1 + $0x40] ss:$24 sps:$4 sm:$0xff]  }
  0x2b   :  { %664 = vmatpush2.bf16.msra.mxu0 %v2528_v34  ;;  %v2639_v34 = vld [vmem:[%s3676_s3 + $0x80] ss:$8 sps:$4 sm:$0xff]  }
  0x2c   :  { %665 = vmatprep.subr.bf16.mxu0 %v2529_v35  ;;  %703 = vmatpush2.bf16.msra.mxu1 %v2575_v52  ;;  %v2644_v35 = vld [vmem:[%s3676_s3 + $0x174] ss:$8 sps:$4 sm:$0xff]  }
  0x2d   :  { %704 = vmatprep.subr.bf16.mxu1 %v2576_v53  ;;  %v2716_v52 = vld [vmem:[%s3674_s1 + $0x2e4] ss:$24 sps:$4 sm:$0xff]   ;;  %v2714_v53 = vld [vmem:[%s3674_s1 + $0x2e0] ss:$24 sps:$4 sm:$0xff]  }
  0x2f   :  { %666 = vmatpush2.bf16.msra.mxu0 %v2531_v38  ;;  %v2693_v38 = vld [vmem:[%s3674_s1 + $0x130] ss:$24 sps:$4 sm:$0xff]  }
  0x30   :  { %667 = vmatprep.subr.bf16.mxu0 %v2532_v39  ;;  %705 = vmatpush2.bf16.msra.mxu1 %v2578_v55  ;;  %v2695_v39 = vld [vmem:[%s3674_s1 + $0x134] ss:$24 sps:$4 sm:$0xff]   ;;  %v2717_v55 = vld [vmem:[%s3674_s1 + $0x2b0] ss:$24 sps:$4 sm:$0xff]  }
  0x31   :  { %706 = vmatprep.subr.bf16.mxu1 %v2579_v56  ;;  %v2722_v56 = vld [vmem:[%s3674_s1 + $0x284] ss:$24 sps:$4 sm:$0xff]  }
  0x33   :  { %668 = vmatpush2.bf16.msra.mxu0 %v2534_v42  ;;  %v2701_v42 = vld [vmem:[%s3674_s1 + $0xd4] ss:$24 sps:$4 sm:$0xff]  }
  0x34   :  { %669 = vmatprep.subr.bf16.mxu0 %v2535_v43  ;;  %707 = vmatpush2.bf16.msra.mxu1 %v2581_v58  ;;  %v2699_v43 = vld [vmem:[%s3674_s1 + $0xd0] ss:$24 sps:$4 sm:$0xff]   ;;  %v2720_v58 = vld [vmem:[%s3674_s1 + $0x280] ss:$24 sps:$4 sm:$0xff]  }
  0x35   :  { %708 = vmatprep.subr.bf16.mxu1 %v2582_v59  ;;  %v2725_v59 = vld [vmem:[%s3674_s1 + $0x254] ss:$24 sps:$4 sm:$0xff]  }
  0x37   :  { %670 = vmatpush2.bf16.msra.mxu0 %v2537_v46  ;;  %v2707_v46 = vld [vmem:[%s3674_s1 + $0x74] ss:$24 sps:$4 sm:$0xff]  }
  0x38   :  { %671 = vmatprep.subr.bf16.mxu0 %v2538_v47  ;;  %709 = vmatpush2.bf16.msra.mxu1 %v2584_v60  ;;  %v2705_v47 = vld [vmem:[%s3674_s1 + $0x70] ss:$24 sps:$4 sm:$0xff]  }
  0x39   :  { %710 = vmatprep.subr.bf16.mxu1 %v2585_v61  ;;  %v2723_v60 = vld [vmem:[%s3674_s1 + $0x250] ss:$24 sps:$4 sm:$0xff]   ;;  %v2728_v61 = vld [vmem:[%s3674_s1 + $0x224] ss:$24 sps:$4 sm:$0xff]  }
  0x3b   :  { %672 = vmatpush2.bf16.msra.mxu0 %v2540_v50  ;;  %v2713_v50 = vld [vmem:[%s3674_s1 + $0x14] ss:$24 sps:$4 sm:$0xff]  }
  0x3c   :  { %673 = vmatprep.subr.bf16.mxu0 %v2544_v51  ;;  %711 = vmatpush2.bf16.msra.mxu1 %v2587_v62  ;;  %v2711_v51 = vld [vmem:[%s3674_s1 + $0x10] ss:$24 sps:$4 sm:$0xff]   ;;  %v2726_v62 = vld [vmem:[%s3674_s1 + $0x220] ss:$24 sps:$4 sm:$0xff]  }
  0x3d   :  { %712 = vmatprep.subr.bf16.mxu1 %v2588_v63  ;;  %v2731_v63 = vld [vmem:[%s3674_s1 + $0x1f4] ss:$24 sps:$4 sm:$0xff]  }
  0x3f   :  { %674 = vmatpush2.bf16.msra.mxu0 %v2546_v54  ;;  %v2719_v54 = vld [vmem:[%s3674_s1 + $0x2b4] ss:$24 sps:$4 sm:$0xff]  }
  0x40   :  { %713 = vmatpush2.bf16.msra.mxu1 %v2590_v0  ;;  %725 = vmatprep.subr.bf16.mxu0 %v2689_v37  ;;  %v2729_v0 = vld [vmem:[%s3674_s1 + $0x1f0] ss:$24 sps:$4 sm:$0xff]  }
  0x41   :  { %714 = vmatprep.subr.bf16.mxu1 %v2591_v1  ;;  %v2734_v1 = vld [vmem:[%s3674_s1 + $0x1c4] ss:$24 sps:$4 sm:$0xff]   ;;  %v2651_v37 = vld [vmem:[%s3676_s3 + $0x140] ss:$8 sps:$4 sm:$0xff]  }
  0x42   :  { %676 = vmatmul.mubr.bf16.vlgmr.msra.gmra.mxu0 %v3052_v57 }
  0x43   :  { %757 = vmatprep.mubr.bf16.mxu0 %v2938_v20  ;;  %v2618_v20 = vld [vmem:[%s3676_s3 + $0xf0] ss:$8 sps:$4 sm:$0xff]   ;;  %726 = vmatpush1.bf16.msra.mxu0 %v2687_v36 }
  0x44   :  { %715 = vmatpush2.bf16.msra.mxu1 %v2593_v2  ;;  %727 = vmatprep.subr.bf16.mxu0 %v2695_v39  ;;  %v126_v2 = vlaneseq  ;;  %v2748_v36 = vld [vmem:[%s3677_s5 + $0x50] sm:$0xff]  }
  0x45   :  { %972 = vmatprep.subr.bf16.mxu1 %v2596_v3  ;;  %v2749_v39 = vld [vmem:[%s3677_s5 + $0x10] sm:$0xff]  }
  0x46   :  { %v3270_v3 = vshrl.u32 %v126_v2, 7  ;;  %v2681_v2 = vld [vmem:[%s3676_s3 + $0x1a0] ss:$8 sps:$4 sm:$0xff]  }
  0x47   :  { %717 = vmatmul.mubr.bf16.vlgmr.msra.gmra.mxu1 %v3052_v57  ;;  %728 = vmatpush1.bf16.msra.mxu0 %v2693_v38  ;;  %v2656_v38 = vld [vmem:[%s3676_s3 + $0x134] ss:$8 sps:$4 sm:$0xff]  }
  0x48   :  { %973 = vmatpush1.bf16.msra.mxu1 %v2594_v4  ;;  %729 = vmatprep.subr.bf16.mxu0 %v2698_v40  ;;  %v2732_v4 = vld [vmem:[%s3674_s1 + $0x1c0] ss:$24 sps:$4 sm:$0xff]  }
  0x49   :  { %974 = vmatprep.subr.bf16.mxu1 %v2599_v5  ;;  %v2737_v5 = vld [vmem:[%s3674_s1 + $0x194] ss:$24 sps:$4 sm:$0xff]  }
  0x4b   :  { %730 = vmatpush1.bf16.msra.mxu0 %v2696_v41 }
  0x4c   :  { %975 = vmatpush1.bf16.msra.mxu1 %v2597_v6  ;;  %731 = vmatprep.subr.bf16.mxu0 %v2701_v42  ;;  %v3279_v6 = vsub.s32 0, %v3270_v3  ;;  %v2654_v42 = vld [vmem:[%s3676_s3 + $0x130] ss:$8 sps:$4 sm:$0xff]  }
  0x4d   :  { %976 = vmatprep.subr.bf16.mxu1 %v2602_v7  ;;  %v2735_v7 = vld [vmem:[%s3674_s1 + $0x190] ss:$24 sps:$4 sm:$0xff]  }
  0x4f   :  { %732 = vmatpush1.bf16.msra.mxu0 %v2699_v43  ;;  %v2659_v43 = vld [vmem:[%s3676_s3 + $0x124] ss:$8 sps:$4 sm:$0xff]  }
  0x50   :  { %977 = vmatpush1.bf16.msra.mxu1 %v2600_v8  ;;  %733 = vmatprep.subr.bf16.mxu0 %v2704_v44  ;;  %v3287_v8 = vld [vmem:[%s3678_s2] sm:$0x3f] }
  0x51   :  { %978 = vmatprep.subr.bf16.mxu1 %v2605_v9  ;;  %v3290_v9 = vsub.s32 1, %v3270_v3 }
  0x53   :  { %734 = vmatpush1.bf16.msra.mxu0 %v2702_v45 }
  0x54   :  { %979 = vmatpush1.bf16.msra.mxu1 %v2603_v10  ;;  %735 = vmatprep.subr.bf16.mxu0 %v2707_v46  ;;  %v2738_v10 = vld [vmem:[%s3677_s5 + $0x78] sm:$0xff]  }
  0x55   :  { %980 = vmatprep.subr.bf16.mxu1 %v2608_v11  ;;  %v129_v11 = vrot.slane %v3287_v8, %v3279_v6 }
  0x57   :  { %736 = vmatpush1.bf16.msra.mxu0 %v2705_v47  ;;  %v2657_v47 = vld [vmem:[%s3676_s3 + $0x120] ss:$8 sps:$4 sm:$0xff]  }
  0x58   :  { %981 = vmatpush1.bf16.msra.mxu1 %v2606_v12  ;;  %737 = vmatprep.subr.bf16.mxu0 %v2710_v48  ;;  %v2739_v12 = vld [vmem:[%s3677_s5 + $0x38] sm:$0xff]  }
  0x59   :  { %982 = vmatprep.subr.bf16.mxu1 %v2611_v13  ;;  %v133_v13 = vrot.slane %v3287_v8, %v3290_v9 }
  0x5b   :  { %738 = vmatpush1.bf16.msra.mxu0 %v2708_v49  ;;  %v2662_v49 = vld [vmem:[%s3676_s3 + $0x114] ss:$8 sps:$4 sm:$0xff]  }
  0x5c   :  { %983 = vmatpush1.bf16.msra.mxu1 %v2609_v14  ;;  %739 = vmatprep.subr.bf16.mxu0 %v2713_v50  ;;  %v2740_v14 = vld [vmem:[%s3677_s5 + $0x70] sm:$0xff]  }
  0x5d   :  { %984 = vmatprep.subr.bf16.mxu1 %v2614_v15 }
  0x5f   :  { %740 = vmatpush1.bf16.msra.mxu0 %v2711_v51  ;;  %v2660_v51 = vld [vmem:[%s3676_s3 + $0x110] ss:$8 sps:$4 sm:$0xff]  }
  0x60   :  { %985 = vmatpush1.bf16.msra.mxu1 %v2612_v16  ;;  %741 = vmatprep.subr.bf16.mxu0 %v2716_v52  ;;  %v2665_v52 = vld [vmem:[%s3676_s3 + $0x104] ss:$8 sps:$4 sm:$0xff]  }
  0x61   :  { %986 = vmatprep.subr.bf16.mxu1 %v2617_v17 }
  0x63   :  { %742 = vmatpush2.bf16.msra.mxu0 %v2714_v53  ;;  %v2663_v53 = vld [vmem:[%s3676_s3 + $0x100] ss:$8 sps:$4 sm:$0xff]  }
  0x64   :  { %987 = vmatpush1.bf16.msra.mxu1 %v2615_v18  ;;  %743 = vmatprep.subr.bf16.mxu0 %v2719_v54  ;;  %v2741_v18 = vld [vmem:[%s3677_s5 + $0x30] sm:$0xff]  }
  0x65   :  { %988 = vmatprep.subr.bf16.mxu1 %v2620_v19  ;;  %v2668_v54 = vld [vmem:[%s3676_s3 + $0x1f4] ss:$8 sps:$4 sm:$0xff]  }
  0x67   :  { %744 = vmatpush2.bf16.msra.mxu0 %v2717_v55  ;;  %v2666_v55 = vld [vmem:[%s3676_s3 + $0x1f0] ss:$8 sps:$4 sm:$0xff]  }
  0x68   :  { %989 = vmatpush2.bf16.msra.mxu1 %v2618_v20  ;;  %745 = vmatprep.subr.bf16.mxu0 %v2722_v56  ;;  %v2742_v20 = vld [vmem:[%s3677_s5 + $0x68] sm:$0xff]  }
  0x69   :  { %990 = vmatprep.subr.bf16.mxu1 %v2623_v21  ;;  %v2671_v56 = vld [vmem:[%s3676_s3 + $0x1e4] ss:$8 sps:$4 sm:$0xff]  }
  0x6b   :  { %746 = vmatpush2.bf16.msra.mxu0 %v2720_v58  ;;  %v2669_v58 = vld [vmem:[%s3676_s3 + $0x1e0] ss:$8 sps:$4 sm:$0xff]  }
  0x6c   :  { %991 = vmatpush2.bf16.msra.mxu1 %v2621_v22  ;;  %747 = vmatprep.subr.bf16.mxu0 %v2725_v59  ;;  %v2674_v59 = vld [vmem:[%s3676_s3 + $0x1d4] ss:$8 sps:$4 sm:$0xff]  }
  0x6d   :  { %992 = vmatprep.subr.bf16.mxu1 %v2626_v23  ;;  %v2642_v23 = vld [vmem:[%s3676_s3 + $0x170] ss:$8 sps:$4 sm:$0xff]  }
  0x6f   :  { %748 = vmatpush2.bf16.msra.mxu0 %v2723_v60  ;;  %v2672_v60 = vld [vmem:[%s3676_s3 + $0x1d0] ss:$8 sps:$4 sm:$0xff]  }
  0x70   :  { %993 = vmatpush2.bf16.msra.mxu1 %v2624_v24  ;;  %749 = vmatprep.subr.bf16.mxu0 %v2728_v61  ;;  %v2677_v61 = vld [vmem:[%s3676_s3 + $0x1c4] ss:$8 sps:$4 sm:$0xff]  }
  0x71   :  { %994 = vmatprep.subr.bf16.mxu1 %v2629_v25  ;;  %v2647_v25 = vld [vmem:[%s3676_s3 + $0x164] ss:$8 sps:$4 sm:$0xff]  }
  0x73   :  { %750 = vmatpush2.bf16.msra.mxu0 %v2726_v62  ;;  %v2675_v62 = vld [vmem:[%s3676_s3 + $0x1c0] ss:$8 sps:$4 sm:$0xff]  }
  0x74   :  { %995 = vmatpush2.bf16.msra.mxu1 %v2627_v26  ;;  %751 = vmatprep.subr.bf16.mxu0 %v2731_v63  ;;  %v2743_v26 = vld [vmem:[%s3677_s5 + $0x28] sm:$0xff]   ;;  %v2680_v63 = vld [vmem:[%s3676_s3 + $0x1b4] ss:$8 sps:$4 sm:$0xff]  }
  0x75   :  { %996 = vmatprep.subr.bf16.mxu1 %v2632_v27  ;;  %v2744_v27 = vld [vmem:[%s3677_s5 + $0x60] sm:$0xff]  }
  0x77   :  { %752 = vmatpush2.bf16.msra.mxu0 %v2729_v0  ;;  %v2678_v0 = vld [vmem:[%s3676_s3 + $0x1b0] ss:$8 sps:$4 sm:$0xff]  }
  0x78   :  { %997 = vmatpush2.bf16.msra.mxu1 %v2630_v28  ;;  %753 = vmatprep.subr.bf16.mxu0 %v2734_v1  ;;  %v2645_v28 = vld [vmem:[%s3676_s3 + $0x160] ss:$8 sps:$4 sm:$0xff]   ;;  %v2683_v1 = vld [vmem:[%s3676_s3 + $0x1a4] ss:$8 sps:$4 sm:$0xff]  }
  0x79   :  { %998 = vmatprep.subr.bf16.mxu1 %v2635_v29  ;;  %v2650_v29 = vld [vmem:[%s3676_s3 + $0x154] ss:$8 sps:$4 sm:$0xff]  }
  0x7b   :  { %754 = vmatpush2.bf16.msra.mxu0 %v2732_v4  ;;  %v136_v4 = vsub.s32 2, %v3270_v3 }
  0x7c   :  { %999 = vmatpush2.bf16.msra.mxu1 %v2633_v30  ;;  %755 = vmatprep.subr.bf16.mxu0 %v2737_v5  ;;  %v2745_v30 = vld [vmem:[%s3677_s5 + $0x20] sm:$0xff]   ;;  %v2686_v5 = vld [vmem:[%s3676_s3 + $0x194] ss:$8 sps:$4 sm:$0xff]  }
  0x7d   :  { %1000 = vmatprep.subr.bf16.mxu1 %v2638_v31  ;;  %v2746_v31 = vld [vmem:[%s3677_s5 + $0x58] sm:$0xff]  }
  0x7f   :  { %756 = vmatpush2.bf16.msra.mxu0 %v2735_v7  ;;  %v2684_v7 = vld [vmem:[%s3676_s3 + $0x190] ss:$8 sps:$4 sm:$0xff]  }
  0x80   :  { %1001 = vmatpush2.bf16.msra.mxu1 %v2636_v32  ;;  %2430 = vmatprep.subr.bf16.mxu0 %v2738_v10  ;;  %v2648_v32 = vld [vmem:[%s3676_s3 + $0x150] ss:$8 sps:$4 sm:$0xff]   ;;  %v137_v10 = vrot.slane %v3287_v8, %v136_v4  ;;  %v2775_v4 = vld [vmem:[%s3676_s3 + $0x264] ss:$8 sps:$4 sm:$0xff]  }
  0x81   :  { %1002 = vmatprep.subr.bf16.mxu1 %v2641_v33  ;;  %v2653_v33 = vld [vmem:[%s3676_s3 + $0x144] ss:$8 sps:$4 sm:$0xff]  }
  0x82   :  { %758 = vmatmul.mubr.bf16.vlgmr.msra.gmra.mxu0 %v3052_v57 }
  0x83   :  { %2431 = vmatpush3.bf16.msra.mxu0 %v2739_v12  ;;  %v2690_v12 = vld [vmem:[%s3676_s3 + $0x180] ss:$8 sps:$4 sm:$0xff]  }
  0x84   :  { %1003 = vmatpush2.bf16.msra.mxu1 %v2639_v34  ;;  %2432 = vmatprep.subr.bf16.mxu0 %v2740_v14  ;;  %v2747_v34 = vld [vmem:[%s3677_s5 + $0x18] sm:$0xff]  }
  0x85   :  { %1399 = vmatprep.subr.bf16.mxu1 %v2644_v35  ;;  %v140_v35 = vsub.s32 3, %v3270_v3 }
  0x87   :  { %2433 = vmatpush3.bf16.msra.mxu0 %v2741_v18  ;;  %v141_v40 = vrot.slane %v3287_v8, %v140_v35  ;;  %v2753_v18 = vld [vmem:[%s3677_s5] sm:$0xff]   ;;  %v2756_v35 = vld [vmem:[%s3677_s5 + $0xf0] sm:$0xff]  }
  0x88   :  { %2434 = vmatprep.subr.bf16.mxu0 %v2742_v20 }
  0x8b   :  { %2435 = vmatpush3.bf16.msra.mxu0 %v2743_v26 }
  0x8c   :  { %2436 = vmatprep.subr.bf16.mxu0 %v2744_v27 }
  0x8f   :  { %2437 = vmatpush3.bf16.msra.mxu0 %v2745_v30 }
  0x90   :  { %2438 = vmatprep.subr.bf16.mxu0 %v2746_v31 }
  0x93   :  { %2439 = vmatpush3.bf16.msra.mxu0 %v2747_v34 }
  0x94   :  { %2440 = vmatprep.subr.bf16.mxu0 %v2748_v36  ;;  %v2757_v36 = vld [vmem:[%s3677_s5 + $0xb0] sm:$0xff]  }
  0x97   :  { %2441 = vmatpush3.bf16.msra.mxu0 %v2749_v39  ;;  %v2760_v39 = vld [vmem:[%s3677_s5 + $0xe0] sm:$0xff]  }
 0x102   :  { %v677_v15 = vpop.f32.mrf.mxu0 }
 0x103   :  { %v678_v16 = vadd.f32 %v677_v15, %v129_v11  ;;  %v2692_v11 = vld [vmem:[%s3676_s3 + $0x184] ss:$8 sps:$4 sm:$0xff]  }
 0x104   :  { %v679_v17 = vpop.f32.mrf.mxu0  ;;  %v2750_v15 = vld [vmem:[%s3677_s5 + $0x48] sm:$0xff]  }
 0x105   :  { %v680_v19 = vadd.f32 %v679_v17, %v133_v13  ;;  %v766_v57 = vpack.c.bf16 %v678_v16, %v678_v16  ;;  %v2751_v16 = vld [vmem:[%s3677_s5 + $0x8] sm:$0xff]   ;;  %2442 = vmatprep.subr.bf16.mxu0 %v2750_v15  ;;  %v2752_v17 = vld [vmem:[%s3677_s5 + $0x40] sm:$0xff]  }
 0x106   :  { %v681_v21 = vpop.f32.mrf.mxu0  ;;  %2443 = vmatpush3.bf16.msra.mxu0 %v2751_v16  ;;  %v2787_v15 = vld [vmem:[%s3676_s3 + $0x224] ss:$8 sps:$4 sm:$0xff]   ;;  %v2785_v16 = vld [vmem:[%s3676_s3 + $0x220] ss:$8 sps:$4 sm:$0xff]  }
 0x107   :  { %v767_v22 = vpack.c.bf16 %v680_v19, %v680_v19  ;;  %v718_v41 = vpop.f32.mrf.mxu1  ;;  %2444 = vmatprep.subr.bf16.mxu0 %v2752_v17  ;;  %v2754_v19 = vld [vmem:[%s3677_s5 + $0xf8] sm:$0xff]   ;;  %v800_v21 = vld [vmem:[%s3679_s4] sm:$0x3] }
 0x108   :  { %v682_v24 = vpop.f32.mrf.mxu0  ;;  %v719_v13 = vadd.f32 %v718_v41, %v137_v10  ;;  %v2762_v41 = vld [vmem:[%s3677_s5 + $0xd8] sm:$0xff]  }
 0x109   :  { %1004 = vmatprep.mubr.bf16.mxu1 %v767_v22  ;;  %v720_v44 = vpop.f32.mrf.mxu1  ;;  %v809_v24 = vrot.slane %v800_v21, %v3290_v9  ;;  %v2776_v10 = vld [vmem:[%s3676_s3 + $0x250] ss:$8 sps:$4 sm:$0xff]   ;;  %v2790_v17 = vld [vmem:[%s3676_s3 + $0x214] ss:$8 sps:$4 sm:$0xff]  }
 0x10a   :  { %1005 = vmatmul.mubr.bf16.vlgmr.msra.gmra.mxu1 %v766_v57  ;;  %v721_v45 = vadd.f32 %v720_v44, %v141_v40  ;;  %v1191_v14 = vpack.c.bf16 %v719_v13, %v719_v13  ;;  %2445 = vmatpush3.bf16.msra.mxu0 %v2753_v18  ;;  %v805_v57 = vrot.slane %v800_v21, %v3279_v6  ;;  %v2761_v40 = vld [vmem:[%s3677_s5 + $0xa0] sm:$0xff]   ;;  %v2765_v44 = vld [vmem:[%s3677_s5 + $0x90] sm:$0xff]  }
 0x10b   :  { %1400 = vmatpush1.bf16.msra.mxu1 %v2642_v23  ;;  %v722_v46 = vpop.f32.mrf.mxu1  ;;  %2452 = vmatprep.subr.bf16.mxu0 %v2754_v19  ;;  %v2784_v13 = vld [vmem:[%s3676_s3 + $0x234] ss:$8 sps:$4 sm:$0xff]   ;;  %v2788_v18 = vld [vmem:[%s3676_s3 + $0x210] ss:$8 sps:$4 sm:$0xff]   ;;  %v2793_v19 = vld [vmem:[%s3676_s3 + $0x204] ss:$8 sps:$4 sm:$0xff]  }
 0x10c   :  { %1401 = vmatprep.subr.bf16.mxu1 %v2647_v25  ;;  %v1192_v48 = vpack.c.bf16 %v721_v45, %v721_v45  ;;  %v2766_v45 = vld [vmem:[%s3677_s5 + $0xc8] sm:$0xff]  }
 0x10d   :  { %v723_v50 = vpop.f32.mrf.mxu1  ;;  %v2767_v46 = vld [vmem:[%s3677_s5 + $0x88] sm:$0xff]  }
 0x10e   :  { %1431 = vmatprep.mubr.bf16.mxu1 %v1192_v48  ;;  %v2769_v48 = vld [vmem:[%s3677_s5 + $0x80] sm:$0xff]   ;;  %v148_v50 = vsub.s32 5, %v3270_v3 }
 0x10f   :  { %1402 = vmatpush1.bf16.msra.mxu1 %v2645_v28  ;;  %v2791_v21 = vld [vmem:[%s3676_s3 + $0x200] ss:$8 sps:$4 sm:$0xff]  }
 0x110   :  { %1403 = vmatprep.subr.bf16.mxu1 %v2650_v29 }
 0x113   :  { %1404 = vmatpush1.bf16.msra.mxu1 %v2648_v32  ;;  %v2755_v32 = vld [vmem:[%s3677_s5 + $0xb8] sm:$0xff]  }
 0x114   :  { %1405 = vmatprep.subr.bf16.mxu1 %v2653_v33 }
 0x117   :  { %1406 = vmatpush1.bf16.msra.mxu1 %v2651_v37  ;;  %v2758_v37 = vld [vmem:[%s3677_s5 + $0xe8] sm:$0xff]  }
 0x118   :  { %1407 = vmatprep.subr.bf16.mxu1 %v2656_v38  ;;  %v2759_v38 = vld [vmem:[%s3677_s5 + $0xa8] sm:$0xff]  }
 0x11b   :  { %1408 = vmatpush1.bf16.msra.mxu1 %v2654_v42  ;;  %v2763_v42 = vld [vmem:[%s3677_s5 + $0x98] sm:$0xff]  }
 0x11c   :  { %1409 = vmatprep.subr.bf16.mxu1 %v2659_v43  ;;  %v2764_v43 = vld [vmem:[%s3677_s5 + $0xd0] sm:$0xff]  }
 0x11f   :  { %1410 = vmatpush1.bf16.msra.mxu1 %v2657_v47  ;;  %v2768_v47 = vld [vmem:[%s3677_s5 + $0xc0] sm:$0xff]  }
 0x120   :  { %1411 = vmatprep.subr.bf16.mxu1 %v2662_v49  ;;  %v2772_v49 = vld [vmem:[%s3676_s3 + $0x274] ss:$8 sps:$4 sm:$0xff]  }
 0x123   :  { %1412 = vmatpush1.bf16.msra.mxu1 %v2660_v51  ;;  %v2232_v51 = vld [vmem:[%s3679_s4 + $0x2] sm:$0x3] }
 0x124   :  { %1413 = vmatprep.subr.bf16.mxu1 %v2665_v52  ;;  %v149_v52 = vrot.slane %v3287_v8, %v148_v50  ;;  %v2830_v50 = vld [vmem:[%s3677_s5 + $0x148] sm:$0xff]  }
 0x127   :  { %1414 = vmatpush1.bf16.msra.mxu1 %v2663_v53  ;;  %v1232_v53 = vrot.slane %v2232_v51, %v3279_v6 }
 0x128   :  { %1415 = vmatprep.subr.bf16.mxu1 %v2668_v54  ;;  %v1236_v54 = vrot.slane %v2232_v51, %v3290_v9  ;;  %v2831_v51 = vld [vmem:[%s3677_s5 + $0x108] sm:$0xff]  }
 0x12b   :  { %1416 = vmatpush2.bf16.msra.mxu1 %v2666_v55 }
 0x12c   :  { %1417 = vmatprep.subr.bf16.mxu1 %v2671_v56 }
 0x12f   :  { %1418 = vmatpush2.bf16.msra.mxu1 %v2669_v58 }
 0x130   :  { %1419 = vmatprep.subr.bf16.mxu1 %v2674_v59 }
 0x133   :  { %1420 = vmatpush2.bf16.msra.mxu1 %v2672_v60 }
 0x134   :  { %1421 = vmatprep.subr.bf16.mxu1 %v2677_v61 }
 0x137   :  { %1422 = vmatpush2.bf16.msra.mxu1 %v2675_v62 }
 0x138   :  { %1423 = vmatprep.subr.bf16.mxu1 %v2680_v63  ;;  %v2770_v63 = vld [vmem:[%s3676_s3 + $0x270] ss:$8 sps:$4 sm:$0xff]  }
 0x13b   :  { %1424 = vmatpush2.bf16.msra.mxu1 %v2678_v0 }
 0x13c   :  { %1425 = vmatprep.subr.bf16.mxu1 %v2683_v1 }
 0x13f   :  { %1426 = vmatpush2.bf16.msra.mxu1 %v2681_v2 }
 0x140   :  { %1427 = vmatprep.subr.bf16.mxu1 %v2686_v5  ;;  %v2773_v5 = vld [vmem:[%s3676_s3 + $0x260] ss:$8 sps:$4 sm:$0xff]  }
 0x142   :  { %v3445_v20 = vpop.f32.mrf.mxu0 }
 0x143   :  { %1428 = vmatpush2.bf16.msra.mxu1 %v2684_v7  ;;  %v2778_v7 = vld [vmem:[%s3676_s3 + $0x254] ss:$8 sps:$4 sm:$0xff]  }
 0x144   :  { %1429 = vmatprep.subr.bf16.mxu1 %v2692_v11  ;;  %v761_v22 = vpop.f32.mrf.mxu0  ;;  %v2781_v11 = vld [vmem:[%s3676_s3 + $0x244] ss:$8 sps:$4 sm:$0xff]  }
 0x145   :  { %v762_v56 = vadd.f32 %v761_v22, %v149_v52  ;;  %v2796_v22 = vld [vmem:[%s3676_s3 + $0x2f4] ss:$8 sps:$4 sm:$0xff]  }
 0x146   :  { %v763_v23 = vpop.f32.mrf.mxu0 }
 0x147   :  { %1430 = vmatpush2.bf16.msra.mxu1 %v2690_v12  ;;  %v1621_v0 = vpack.c.bf16 %v762_v56, %v762_v56  ;;  %v2779_v12 = vld [vmem:[%s3676_s3 + $0x240] ss:$8 sps:$4 sm:$0xff]   ;;  %v2794_v23 = vld [vmem:[%s3676_s3 + $0x2f0] ss:$8 sps:$4 sm:$0xff]  }
 0x148   :  { %v764_v25 = vpop.f32.mrf.mxu0 }
 0x149   :  { %v2802_v25 = vld [vmem:[%s3676_s3 + $0x2d4] ss:$8 sps:$4 sm:$0xff]  }
 0x14a   :  { %1432 = vmatmul.mubr.bf16.vlgmr.msra.gmra.mxu1 %v1191_v14  ;;  %v2782_v14 = vld [vmem:[%s3676_s3 + $0x230] ss:$8 sps:$4 sm:$0xff]  }
 0x1ca   :  { %v1006_v26 = vpop.f32.mrf.mxu1 }
 0x1cb   :  { %v1007_v27 = vadd.f32 %v1006_v26, %v805_v57  ;;  %v2799_v57 = vld [vmem:[%s3676_s3 + $0x2e4] ss:$8 sps:$4 sm:$0xff]   ;;  %v2800_v26 = vld [vmem:[%s3676_s3 + $0x2d0] ss:$8 sps:$4 sm:$0xff]  }
 0x1cc   :  { %v1008_v28 = vpop.f32.mrf.mxu1 }
 0x1cd   :  { %v1009_v29 = vadd.f32 %v1008_v28, %v809_v24  ;;  %v1013_v33 = vpack.c.bf16 %v1007_v27, %v1007_v27  ;;  %v2797_v24 = vld [vmem:[%s3676_s3 + $0x2e0] ss:$8 sps:$4 sm:$0xff]   ;;  %v2805_v27 = vld [vmem:[%s3676_s3 + $0x2c4] ss:$8 sps:$4 sm:$0xff]  }
 0x1ce   :  { %v1010_v30 = vpop.f32.mrf.mxu1  ;;  %v2803_v28 = vld [vmem:[%s3676_s3 + $0x2c0] ss:$8 sps:$4 sm:$0xff]  }
 0x1cf   :  { %v1014_v31 = vpack.c.bf16 %v1009_v29, %v1009_v29  ;;  %v2808_v29 = vld [vmem:[%s3676_s3 + $0x2b4] ss:$8 sps:$4 sm:$0xff]   ;;  %v2806_v30 = vld [vmem:[%s3676_s3 + $0x2b0] ss:$8 sps:$4 sm:$0xff]  }
 0x1d0   :  { %v1011_v34 = vpop.f32.mrf.mxu1 }
 0x1d1   :  { %1182 = vmatprep.mubr.bf16.mxu0 %v1014_v31  ;;  %v2811_v31 = vld [vmem:[%s3676_s3 + $0x2a4] ss:$8 sps:$4 sm:$0xff]   ;;  %v2814_v34 = vld [vmem:[%s3676_s3 + $0x294] ss:$8 sps:$4 sm:$0xff]  }
 0x1d2   :  { %1183 = vmatmul.mubr.bf16.vlgmr.msra.gmra.mxu0 %v1013_v33  ;;  %v144_v33 = vsub.s32 4, %v3270_v3  ;;  %v2815_v3 = vld [vmem:[%s3676_s3 + $0x280] ss:$8 sps:$4 sm:$0xff]  }
 0x1d3   :  { %2453 = vmatpush3.bf16.msra.mxu0 %v2755_v32  ;;  %v2809_v32 = vld [vmem:[%s3676_s3 + $0x2a0] ss:$8 sps:$4 sm:$0xff]  }
 0x1d4   :  { %2454 = vmatprep.subr.bf16.mxu0 %v2756_v35  ;;  %v2812_v35 = vld [vmem:[%s3676_s3 + $0x290] ss:$8 sps:$4 sm:$0xff]  }
 0x1d7   :  { %2455 = vmatpush3.bf16.msra.mxu0 %v2757_v36  ;;  %v145_v36 = vrot.slane %v3287_v8, %v144_v33  ;;  %v2818_v8 = vld [vmem:[%s3677_s5 + $0x178] sm:$0xff]  }
 0x1d8   :  { %2456 = vmatprep.subr.bf16.mxu0 %v2758_v37  ;;  %v2817_v37 = vld [vmem:[%s3676_s3 + $0x284] ss:$8 sps:$4 sm:$0xff]   ;;  %2474 = vmatprep.subr.bf16.mxu1 %v2818_v8 }
 0x1db   :  { %2457 = vmatpush3.bf16.msra.mxu0 %v2759_v38  ;;  %v760_v38 = vadd.f32 %v3445_v20, %v145_v36  ;;  %v2821_v20 = vld [vmem:[%s3677_s5 + $0x130] sm:$0xff]  }
 0x1dc   :  { %2458 = vmatprep.subr.bf16.mxu0 %v2760_v39 }
 0x1dd   :  { %v1620_v39 = vpack.c.bf16 %v760_v38, %v760_v38 }
 0x1df   :  { %2459 = vmatpush3.bf16.msra.mxu0 %v2761_v40  ;;  %v2819_v40 = vld [vmem:[%s3677_s5 + $0x138] sm:$0xff]  }
 0x1e0   :  { %2460 = vmatprep.subr.bf16.mxu0 %v2762_v41  ;;  %v2820_v41 = vld [vmem:[%s3677_s5 + $0x170] sm:$0xff]   ;;  %2475 = vmatpush3.bf16.msra.mxu1 %v2819_v40 }
 0x1e1   :  { %2476 = vmatprep.subr.bf16.mxu1 %v2820_v41 }
 0x1e3   :  { %2461 = vmatpush3.bf16.msra.mxu0 %v2763_v42  ;;  %v2822_v42 = vld [vmem:[%s3677_s5 + $0x168] sm:$0xff]  }
 0x1e4   :  { %2462 = vmatprep.subr.bf16.mxu0 %v2764_v43  ;;  %2477 = vmatpush3.bf16.msra.mxu1 %v2821_v20  ;;  %v2823_v43 = vld [vmem:[%s3677_s5 + $0x128] sm:$0xff]  }
 0x1e5   :  { %2478 = vmatprep.subr.bf16.mxu1 %v2822_v42 }
 0x1e7   :  { %2463 = vmatpush3.bf16.msra.mxu0 %v2765_v44  ;;  %v2824_v44 = vld [vmem:[%s3677_s5 + $0x160] sm:$0xff]  }
 0x1e8   :  { %2464 = vmatprep.subr.bf16.mxu0 %v2766_v45  ;;  %2479 = vmatpush3.bf16.msra.mxu1 %v2823_v43  ;;  %v2825_v45 = vld [vmem:[%s3677_s5 + $0x120] sm:$0xff]  }
 0x1e9   :  { %2480 = vmatprep.subr.bf16.mxu1 %v2824_v44 }
 0x1eb   :  { %2465 = vmatpush3.bf16.msra.mxu0 %v2767_v46  ;;  %v2826_v46 = vld [vmem:[%s3677_s5 + $0x158] sm:$0xff]  }
 0x1ec   :  { %2466 = vmatprep.subr.bf16.mxu0 %v2768_v47  ;;  %2481 = vmatpush3.bf16.msra.mxu1 %v2825_v45  ;;  %v2827_v47 = vld [vmem:[%s3677_s5 + $0x118] sm:$0xff]  }
 0x1ed   :  { %2482 = vmatprep.subr.bf16.mxu1 %v2826_v46 }
 0x1ef   :  { %2467 = vmatpush3.bf16.msra.mxu0 %v2769_v48  ;;  %v2828_v48 = vld [vmem:[%s3677_s5 + $0x150] sm:$0xff]  }
 0x1f0   :  { %1828 = vmatprep.subr.bf16.mxu0 %v2772_v49  ;;  %2483 = vmatpush3.bf16.msra.mxu1 %v2827_v47  ;;  %v2829_v49 = vld [vmem:[%s3677_s5 + $0x110] sm:$0xff]  }
 0x1f1   :  { %2484 = vmatprep.subr.bf16.mxu1 %v2828_v48 }
 0x1f4   :  { %2485 = vmatpush3.bf16.msra.mxu1 %v2829_v49 }
 0x1f5   :  { %2486 = vmatprep.subr.bf16.mxu1 %v2830_v50 }
 0x1f8   :  { %2487 = vmatpush3.bf16.msra.mxu1 %v2831_v51 }
 0x20a   :  { %v1433_v55 = vpop.f32.mrf.mxu1 }
 0x20b   :  { %v1434_v58 = vadd.f32 %v1433_v55, %v1232_v53  ;;  %v2183_v53 = vld [vmem:[%s3680_s6] ss:$0 sm:$0xff] }
 0x20c   :  { %v1435_v59 = vpop.f32.mrf.mxu1  ;;  %v2832_v55 = vld [vmem:[%s3677_s5 + $0x140] sm:$0xff]  }
 0x20d   :  { %v1436_v60 = vadd.f32 %v1435_v59, %v1236_v54  ;;  %v1440_v1 = vpack.c.bf16 %v1434_v58, %v1434_v58  ;;  %v2833_v58 = vld [vmem:[%s3677_s5 + $0x100] sm:$0xff]   ;;  %2488 = vmatprep.subr.bf16.mxu1 %v2832_v55 }
 0x20e   :  { %v1437_v61 = vpop.f32.mrf.mxu1  ;;  %2489 = vmatpush3.bf16.msra.mxu1 %v2833_v58 }
 0x20f   :  { %v1441_v62 = vpack.c.bf16 %v1436_v60, %v1436_v60 }
 0x210   :  { %v1438_v2 = vpop.f32.mrf.mxu1 }
 0x211   :  { %1611 = vmatprep.mubr.bf16.mxu0 %v1441_v62 }
 0x212   :  { %1612 = vmatmul.mubr.bf16.vlgmr.msra.gmra.mxu0 %v1440_v1 }
 0x213   :  { %1829 = vmatpush1.bf16.msra.mxu0 %v2770_v63  ;;  %1860 = vmatprep.mubr.bf16.mxu0 %v1621_v0  ;;  %v2298_v63 = vld [vmem:[%s3680_s6 + $0x1] ss:$0 sm:$0xff] }
 0x214   :  { %1830 = vmatprep.subr.bf16.mxu0 %v2775_v4 }
 0x217   :  { %1831 = vmatpush1.bf16.msra.mxu0 %v2773_v5 }
 0x218   :  { %1832 = vmatprep.subr.bf16.mxu0 %v2778_v7  ;;  %v2347_v7 = vld [vmem:[%s3679_s4 + $0x4] sm:$0x3] }
 0x21b   :  { %1833 = vmatpush1.bf16.msra.mxu0 %v2776_v10  ;;  %v1661_v10 = vrot.slane %v2347_v7, %v3279_v6 }
 0x21c   :  { %1834 = vmatprep.subr.bf16.mxu0 %v2781_v11  ;;  %v1665_v11 = vrot.slane %v2347_v7, %v3290_v9 }
 0x21f   :  { %1835 = vmatpush1.bf16.msra.mxu0 %v2779_v12 }
 0x220   :  { %1836 = vmatprep.subr.bf16.mxu0 %v2784_v13 }
 0x223   :  { %1837 = vmatpush1.bf16.msra.mxu0 %v2782_v14 }
 0x224   :  { %1838 = vmatprep.subr.bf16.mxu0 %v2787_v15 }
 0x227   :  { %1839 = vmatpush1.bf16.msra.mxu0 %v2785_v16 }
 0x228   :  { %1840 = vmatprep.subr.bf16.mxu0 %v2790_v17 }
 0x22b   :  { %1841 = vmatpush1.bf16.msra.mxu0 %v2788_v18 }
 0x22c   :  { %1842 = vmatprep.subr.bf16.mxu0 %v2793_v19 }
 0x22f   :  { %1843 = vmatpush1.bf16.msra.mxu0 %v2791_v21 }
 0x230   :  { %1844 = vmatprep.subr.bf16.mxu0 %v2796_v22  ;;  %v2413_v22 = vld [vmem:[%s3680_s6 + $0x2] ss:$0 sm:$0xff] }
 0x233   :  { %1845 = vmatpush2.bf16.msra.mxu0 %v2794_v23 }
 0x234   :  { %1846 = vmatprep.subr.bf16.mxu0 %v2799_v57 }
 0x237   :  { %1847 = vmatpush2.bf16.msra.mxu0 %v2797_v24 }
 0x238   :  { %1848 = vmatprep.subr.bf16.mxu0 %v2802_v25 }
 0x23b   :  { %1849 = vmatpush2.bf16.msra.mxu0 %v2800_v26 }
 0x23c   :  { %1850 = vmatprep.subr.bf16.mxu0 %v2805_v27 }
 0x23f   :  { %1851 = vmatpush2.bf16.msra.mxu0 %v2803_v28 }
 0x240   :  { %1852 = vmatprep.subr.bf16.mxu0 %v2808_v29 }
 0x243   :  { %1853 = vmatpush2.bf16.msra.mxu0 %v2806_v30 }
 0x244   :  { %1854 = vmatprep.subr.bf16.mxu0 %v2811_v31 }
 0x247   :  { %1855 = vmatpush2.bf16.msra.mxu0 %v2809_v32 }
 0x248   :  { %1856 = vmatprep.subr.bf16.mxu0 %v2814_v34 }
 0x24b   :  { %1857 = vmatpush2.bf16.msra.mxu0 %v2812_v35 }
 0x24c   :  { %1858 = vmatprep.subr.bf16.mxu0 %v2817_v37 }
 0x24f   :  { %1859 = vmatpush2.bf16.msra.mxu0 %v2815_v3 }
 0x252   :  { %1861 = vmatmul.mubr.bf16.vlgmr.msra.gmra.mxu0 %v1620_v39 }
 0x292   :  { %v2446_v52 = vpop.f32.mrf.mxu0 }
 0x294   :  { %v2447_v54 = vpop.f32.mrf.mxu0 }
 0x295   :  { %v2448_v56 = vadd.f32 %v2447_v54, %v2446_v52 }
 0x296   :  { %v2449_v59 = vpop.f32.mrf.mxu0 }
 0x297   :  { %v1185_v60 = vadd.f32 %v2448_v56, %v2183_v53 }
 0x298   :  { %v2450_v61 = vpop.f32.mrf.mxu0 }
 0x299   :  { %1190 = vst [vmem:[%s3681_s7] sm:$0xff] %v1185_v60 }
 0x2d2   :  { %v2468_v62 = vpop.f32.mrf.mxu0 }
 0x2d4   :  { %v2469_v0 = vpop.f32.mrf.mxu0 }
 0x2d5   :  { %v2470_v1 = vadd.f32 %v2469_v0, %v2468_v62 }
 0x2d6   :  { %v2471_v2 = vpop.f32.mrf.mxu0 }
 0x2d7   :  { %v1614_v4 = vadd.f32 %v2470_v1, %v2298_v63 }
 0x2d8   :  { %v2472_v5 = vpop.f32.mrf.mxu0 }
 0x2d9   :  { %1619 = vst [vmem:[%s3681_s7 + $0x8] sm:$0xff] %v1614_v4 }
 0x312   :  { %v1862_v12 = vpop.f32.mrf.mxu0 }
 0x313   :  { %v1863_v13 = vadd.f32 %v1862_v12, %v1661_v10 }
 0x314   :  { %v1864_v14 = vpop.f32.mrf.mxu0 }
 0x315   :  { %v1865_v15 = vadd.f32 %v1864_v14, %v1665_v11  ;;  %v1869_v18 = vpack.c.bf16 %v1863_v13, %v1863_v13 }
 0x316   :  { %v1866_v16 = vpop.f32.mrf.mxu0 }
 0x317   :  { %v1870_v17 = vpack.c.bf16 %v1865_v15, %v1865_v15 }
 0x318   :  { %v1867_v19 = vpop.f32.mrf.mxu0 }
 0x319   :  { %2040 = vmatprep.mubr.bf16.mxu1 %v1870_v17 }
 0x31a   :  { %2041 = vmatmul.mubr.bf16.vlgmr.msra.gmra.mxu1 %v1869_v18 }
 0x3da   :  { %v2490_v21 = vpop.f32.mrf.mxu1 }
 0x3dc   :  { %v2491_v23 = vpop.f32.mrf.mxu1 }
 0x3dd   :  { %v2492_v57 = vadd.f32 %v2491_v23, %v2490_v21 }
 0x3de   :  { %v2493_v6 = vpop.f32.mrf.mxu1 }
 0x3df   :  { %v2043_v24 = vadd.f32 %v2492_v57, %v2413_v22 }
 0x3e0   :  { %v2494_v9 = vpop.f32.mrf.mxu1 }
 0x3e1   :  { %2048 = vst [vmem:[%s3681_s7 + $0x10] sm:$0xff] %v2043_v24 }

</bundles_post_ra>
